<compile_context>
chip_gen: v6e
topology: v6e:2x2x1
jax: 0.10.0
libtpu: 0.0.40
codegen_flags: <defaults>
</compile_context>

<pallas_src>
import functools

import jax
import jax.numpy as jnp
from jax.experimental import pallas as pl
from jax.experimental.pallas import tpu as pltpu


_ACTIVATIONS = {
    "relu": lambda v: jnp.maximum(v, 0.0),
    "tanh": jnp.tanh,
    "sigmoid": jax.nn.sigmoid,
    "gelu": jax.nn.gelu,
}


def _round_up(n, m):
    return ((n + m - 1) // m) * m


def _mlp_kernel(x_ref, w_ref, b_ref, o_ref, *, n_layers, activation):
    # x_ref: (TB, D) bf16 activations (zero-padded lanes)
    # w_ref: (L, D, D) bf16 packed weights (already (in, out) layout, zero-padded)
    # b_ref: (L, 1, D) f32 packed biases (zero-padded)
    # o_ref: (TB, D) f32 lane-dense output
    act = _ACTIVATIONS[activation]
    h = x_ref[...]                                   # bf16, straight into the MXU
    for i in range(n_layers):                        # static unroll over layers
        y = jnp.dot(h, w_ref[i], preferred_element_type=jnp.float32) + b_ref[i]
        if i < n_layers - 1:
            h = act(y).astype(jnp.bfloat16)          # f32 activation, bf16 for next MXU pass
        else:
            h = y                                    # last layer: keep f32
    o_ref[...] = h.astype(o_ref.dtype)


def vn_model_forward(x, weights, biases, activation="relu", *, batch_block=256):
    """Fused MLP forward in a single Pallas kernel.

    x:        (B, neurons[0]) float32
    weights:  list of (neurons[i], neurons[i+1]) float32  (already transposed)
    biases:   list of (neurons[i+1],) float32
    """
    n_layers = len(weights)
    assert len(biases) == n_layers
    B, in_dim = x.shape
    out_dim = weights[-1].shape[1]

    # Common lane-padded width for every layer (all widths here are <= 128).
    widths = [in_dim] + [w.shape[1] for w in weights]
    D = _round_up(max(widths), 128)

    use_grid = B > batch_block
    B_pad = _round_up(B, batch_block if use_grid else 8)

    # ---- pack & pad operands (host-side, once per call) -----------------
    xp = jnp.zeros((B_pad, D), jnp.bfloat16).at[:B, :in_dim].set(
        x.astype(jnp.bfloat16))
    Wp = jnp.zeros((n_layers, D, D), jnp.bfloat16)
    bp = jnp.zeros((n_layers, 1, D), jnp.float32)
    for i, (w, b) in enumerate(zip(weights, biases)):
        Wp = Wp.at[i, : w.shape[0], : w.shape[1]].set(w.astype(jnp.bfloat16))
        bp = bp.at[i, 0, : b.shape[-1]].set(b.reshape(-1).astype(jnp.float32))

    kernel = functools.partial(_mlp_kernel, n_layers=n_layers, activation=activation)

    cost = pl.CostEstimate(
        flops=2 * B_pad * n_layers * D * D,
        transcendentals=0,
        bytes_accessed=xp.size * 2 + Wp.size * 2 + bp.size * 4 + B_pad * D * 4,
    )
    out_shape = jax.ShapeDtypeStruct((B_pad, D), jnp.float32)

    if not use_grid:
        # Grid-less call: everything lives in VMEM, no pipeline overhead.
        vmem = pl.BlockSpec(memory_space=pltpu.MemorySpace.VMEM)
        out_padded = pl.pallas_call(
            kernel,
            out_shape=out_shape,
            in_specs=[vmem, vmem, vmem],
            out_specs=vmem,
            cost_estimate=cost,
        )(xp, Wp, bp)
    else:
        # Batch-tiled grid; weights/biases stay resident (block index 0).
        TB = batch_block
        out_padded = pl.pallas_call(
            kernel,
            out_shape=out_shape,
            grid=(B_pad // TB,),
            in_specs=[
                pl.BlockSpec((TB, D), lambda i: (i, 0)),
                pl.BlockSpec((n_layers, D, D), lambda i: (0, 0, 0)),
                pl.BlockSpec((n_layers, 1, D), lambda i: (0, 0, 0)),
            ],
            out_specs=pl.BlockSpec((TB, D), lambda i: (i, 0)),
            compiler_params=pltpu.CompilerParams(
                dimension_semantics=("parallel",),
            ),
            cost_estimate=cost,
        )(xp, Wp, bp)

    return out_padded[:B, :out_dim]


def init_params(neurons, key):
    """Deterministic parameter init matching nn.Linear shapes.

    Returns weights already transposed to (in, out) and 1-D biases (out,).
    """
    weights, biases = [], []
    for i in range(len(neurons) - 1):
        fan_in, fan_out = neurons[i], neurons[i + 1]
        key, kw, kb = jax.random.split(key, 3)
        bound = 1.0 / jnp.sqrt(fan_in)
        # torch Linear weight shape is (out, in); sample that, then transpose.
        w_torch = jax.random.uniform(
            kw, (fan_out, fan_in), jnp.float32, minval=-bound, maxval=bound)
        b = jax.random.uniform(
            kb, (fan_out,), jnp.float32, minval=-bound, maxval=bound)
        weights.append(w_torch.T)   # (in, out)
        biases.append(b)            # (out,)
    return weights, biases


def reference_forward(x, weights, biases, activation="relu"):
    """Pure-JAX f32 reference matching the PyTorch forward."""
    act = _ACTIVATIONS[activation]
    n = len(weights)
    h = x
    for i, (w, b) in enumerate(zip(weights, biases)):
        h = h @ w + b.reshape(1, -1)
        if i < n - 1:
            h = act(h)
    return h


def reference_forward_bf16(x, weights, biases, activation="relu"):
    """Reference with the same bf16-MXU / f32-accumulate math as the kernel."""
    act = _ACTIVATIONS[activation]
    n = len(weights)
    h = x.astype(jnp.bfloat16)
    for i, (w, b) in enumerate(zip(weights, biases)):
        y = jnp.dot(h, w.astype(jnp.bfloat16),
                    preferred_element_type=jnp.float32) + b.reshape(1, -1)
        if i < n - 1:
            h = act(y).astype(jnp.bfloat16)
        else:
            h = y
    return h


if __name__ == "__main__":
    neurons = [32, 64, 48, 16]   # small MLP widths
    batch = 8

    key = jax.random.PRNGKey(0)
    key, kx, kxl = jax.random.split(key, 3)
    x = jax.random.normal(kx, (batch, neurons[0]), dtype=jnp.float32)
    weights, biases = init_params(neurons, key)

    # Small batch -> grid-less, fully VMEM-resident path.
    out = jax.block_until_ready(vn_model_forward(x, weights, biases))
    assert out.shape == (batch, neurons[-1])

    ref_exact = reference_forward_bf16(x, weights, biases)
    ref_f32 = reference_forward(x, weights, biases)
    assert jnp.allclose(out, ref_exact, atol=2e-3, rtol=2e-3), "mismatch vs bf16 reference"
    assert jnp.allclose(out, ref_f32, atol=5e-2, rtol=5e-2), "mismatch vs f32 reference"

    # Larger batch -> batch-tiled 'parallel' grid path (megacore-ready).
    xl = jax.random.normal(kxl, (512, neurons[0]), dtype=jnp.float32)
    out_l = jax.block_until_ready(vn_model_forward(xl, weights, biases))
    ref_l = reference_forward_bf16(xl, weights, biases)
    assert out_l.shape == (512, neurons[-1])
    assert jnp.allclose(out_l, ref_l, atol=2e-3, rtol=2e-3), "mismatch (gridded path)"

    print("KERNEL_OK")
</pallas_src>

<mosaic_0001>
module attributes {stable_mosaic.version = 11 : i64} {
  func.func @_mlp_kernel(%arg0: memref<8x128xbf16, #tpu.memory_space<vmem>>, %arg1: memref<3x128x128xbf16, #tpu.memory_space<vmem>>, %arg2: memref<3x1x128xf32, #tpu.memory_space<vmem>>, %arg3: memref<8x128xf32, #tpu.memory_space<vmem>>) attributes {dimension_semantics = [], scalar_prefetch = 0 : i64, scratch_operands = 0 : i64, tpu.core_type = #tpu.core_type<tc>} {
    %c0 = arith.constant 0 : index
    %c0_0 = arith.constant 0 : index
    %0 = vector.load %arg0[%c0, %c0_0] : memref<8x128xbf16, #tpu.memory_space<vmem>>, vector<8x128xbf16>
    %c0_1 = arith.constant 0 : index
    %c0_2 = arith.constant 0 : index
    %c0_3 = arith.constant 0 : index
    %1 = vector.load %arg1[%c0_1, %c0_2, %c0_3] : memref<3x128x128xbf16, #tpu.memory_space<vmem>>, vector<1x128x128xbf16>
    %2 = vector.shape_cast %1 : vector<1x128x128xbf16> to vector<128x128xbf16>
    %cst = arith.constant dense<0.000000e+00> : vector<8x128xf32>
    %3 = tpu.matmul %0, %2, %cst {dimension_numbers = #tpu.dot_dimension_numbers<[1], [0], [0], [1], [0, 0, 1, 1], [], []>} : vector<8x128xbf16>, vector<128x128xbf16>, vector<8x128xf32> -> vector<8x128xf32>
    %c0_4 = arith.constant 0 : index
    %c0_5 = arith.constant 0 : index
    %c0_6 = arith.constant 0 : index
    %4 = vector.load %arg2[%c0_4, %c0_5, %c0_6] : memref<3x1x128xf32, #tpu.memory_space<vmem>>, vector<1x1x128xf32>
    %5 = vector.shape_cast %4 : vector<1x1x128xf32> to vector<1x128xf32>
    %6 = vector.broadcast %5 : vector<1x128xf32> to vector<8x128xf32>
    %7 = arith.addf %3, %6 : vector<8x128xf32>
    %cst_7 = arith.constant 0.000000e+00 : f32
    %8 = vector.broadcast %cst_7 : f32 to vector<8x128xf32>
    %9 = arith.maximumf %7, %8 : vector<8x128xf32>
    %10 = arith.truncf %9 : vector<8x128xf32> to vector<8x128xbf16>
    %c1 = arith.constant 1 : index
    %c0_8 = arith.constant 0 : index
    %c0_9 = arith.constant 0 : index
    %11 = vector.load %arg1[%c1, %c0_8, %c0_9] : memref<3x128x128xbf16, #tpu.memory_space<vmem>>, vector<1x128x128xbf16>
    %12 = vector.shape_cast %11 : vector<1x128x128xbf16> to vector<128x128xbf16>
    %cst_10 = arith.constant dense<0.000000e+00> : vector<8x128xf32>
    %13 = tpu.matmul %10, %12, %cst_10 {dimension_numbers = #tpu.dot_dimension_numbers<[1], [0], [0], [1], [0, 0, 1, 1], [], []>} : vector<8x128xbf16>, vector<128x128xbf16>, vector<8x128xf32> -> vector<8x128xf32>
    %c1_11 = arith.constant 1 : index
    %c0_12 = arith.constant 0 : index
    %c0_13 = arith.constant 0 : index
    %14 = vector.load %arg2[%c1_11, %c0_12, %c0_13] : memref<3x1x128xf32, #tpu.memory_space<vmem>>, vector<1x1x128xf32>
    %15 = vector.shape_cast %14 : vector<1x1x128xf32> to vector<1x128xf32>
    %16 = vector.broadcast %15 : vector<1x128xf32> to vector<8x128xf32>
    %17 = arith.addf %13, %16 : vector<8x128xf32>
    %cst_14 = arith.constant 0.000000e+00 : f32
    %18 = vector.broadcast %cst_14 : f32 to vector<8x128xf32>
    %19 = arith.maximumf %17, %18 : vector<8x128xf32>
    %20 = arith.truncf %19 : vector<8x128xf32> to vector<8x128xbf16>
    %c2 = arith.constant 2 : index
    %c0_15 = arith.constant 0 : index
    %c0_16 = arith.constant 0 : index
    %21 = vector.load %arg1[%c2, %c0_15, %c0_16] : memref<3x128x128xbf16, #tpu.memory_space<vmem>>, vector<1x128x128xbf16>
    %22 = vector.shape_cast %21 : vector<1x128x128xbf16> to vector<128x128xbf16>
    %cst_17 = arith.constant dense<0.000000e+00> : vector<8x128xf32>
    %23 = tpu.matmul %20, %22, %cst_17 {dimension_numbers = #tpu.dot_dimension_numbers<[1], [0], [0], [1], [0, 0, 1, 1], [], []>} : vector<8x128xbf16>, vector<128x128xbf16>, vector<8x128xf32> -> vector<8x128xf32>
    %c2_18 = arith.constant 2 : index
    %c0_19 = arith.constant 0 : index
    %c0_20 = arith.constant 0 : index
    %24 = vector.load %arg2[%c2_18, %c0_19, %c0_20] : memref<3x1x128xf32, #tpu.memory_space<vmem>>, vector<1x1x128xf32>
    %25 = vector.shape_cast %24 : vector<1x1x128xf32> to vector<1x128xf32>
    %26 = vector.broadcast %25 : vector<1x128xf32> to vector<8x128xf32>
    %27 = arith.addf %23, %26 : vector<8x128xf32>
    %c0_21 = arith.constant 0 : index
    %c0_22 = arith.constant 0 : index
    %28 = vector.load %arg3[%c0_21, %c0_22] : memref<8x128xf32, #tpu.memory_space<vmem>>, vector<8x128xf32>
    tpu.vector_store %arg3[%c0_21, %c0_22], %27 {strides = array<i32>} : memref<8x128xf32, #tpu.memory_space<vmem>>, vector<8x128xf32>,
    return
  }
}

</mosaic_0001>

<bundles_post_ra>
// kernel: tpu_custom_call.1
= control target key start
LH: loop header
LB: loop body
LE: loop exit
PB: predicated region body
PF: predicated region fallthrough
CT: control target
= control target key end

     0   :  { %8 = vsyncpa [#allocation3], 0  ;;  %s689_s0 = inlined_call_operand.hbm [shape: bf16[8,128], index: 0, kind: input, shape index: {}]   ;;  %s690_s1 = inlined_call_operand.hbm [shape: bf16[3,128,128], index: 1, kind: input, shape index: {}]   ;;  %s691_s2 = inlined_call_operand.vmem [shape: f32[3,1,128], index: 2, kind: input, shape index: {}]   ;;  %s692_s3 = inlined_call_operand.hbm [shape: f32[8,128], index: 3, kind: output, shape index: {}]  }
   0x1   :  { %9 = vsyncpa [#allocation6], 0 }
   0x2   :  { %10 = vsyncpa [#allocation4], 0  ;;  %s614_s12 = smov [#allocation2]   ;;  %s615_s14 = smov [#allocation5]  }
   0x3   :  { %s17_s13 = sshll.u32 %s614_s12, 4  ;;  %s26_s15 = sshll.u32 %s615_s14, 4  ;;  %s18_s13 = int_to_ptr.vmem [resolvable:$true] %s17_s13  ;;  %s27_s15 = int_to_ptr.vmem [resolvable:$true] %s26_s15 }
   0x4   :  { %s556_s16 = scalar_lea.vmem %s18_s13, 64  ;;  %p561_p1 = scmp.lt.s32.totalorder %s18_s13, %s18_s13 }
   0x5   :  { %p557_p0 = scmp.ne.s32.totalorder %s18_s13, %s556_s16  ;;  %p562_p2 = scmp.lt.s32.totalorder %s556_s16, %s556_s16 }
   0x7   :  { %p563_p3 = por %p562_p2, %p561_p1 }
   0x9   :  { %p564_p4 = pnand %p563_p3, %p557_p0 }
   0xb   :  { %567 = shalt.err (!%p564_p4)
}
   0xc   :  { %20 = dma.hbm_to_vmem [thread:$0]  %s689_s0, 64, %s18_s13, [#allocation3]  }
   0xd   :  { %s576_s19 = scalar_lea.vmem %s27_s15, 3072  ;;  %p581_p6 = scmp.lt.s32.totalorder %s27_s15, %s27_s15 }
   0xe   :  { %p577_p5 = scmp.ne.s32.totalorder %s27_s15, %s576_s19  ;;  %p582_p7 = scmp.lt.s32.totalorder %s576_s19, %s576_s19 }
  0x10   :  { %p583_p8 = por %p582_p7, %p581_p6 }
  0x12   :  { %p584_p9 = pnand %p583_p8, %p577_p5 }
  0x14   :  { %587 = shalt.err (!%p584_p9)
}
  0x15   :  { %s616_s20 = smov 64   ;;  %s617_s21 = smov 4  }
  0x16   :  { %32 = dma.hbm_to_vmem [thread:$0]  %s690_s1, 3072, %s27_s15, [#allocation6], %s616_s20, %s616_s20, %s617_s21  }
  0x17   :  { %608 = dma.done.wait [#allocation3], 64  }
  0x18   :  { %609 = vsyncadd [#allocation3], 4294967232 }
  0x19   :  { %610 = dma.done.wait [#allocation6], 3072  }
  0x1a   :  { %611 = vsyncadd [#allocation6], 4294964224  ;;  %v618_v0 = vmov 0.0   ;;  %vm619_vm0 = vmmov 0   ;;  %v524_v1 = vld [vmem:[#allocation5 + $0x38] sm:$0xff]   ;;  %v525_v2 = vld [vmem:[#allocation5 + $0x30] sm:$0xff]  }
  0x1b   :  { %457 = vmatprep.subr.bf16.mxu0 %v618_v0  ;;  %473 = vmatprep.mubr.msk.bf16.mxu0 %vm619_vm0, %v618_v0  ;;  %v526_v3 = vld [vmem:[#allocation5 + $0x28] sm:$0xff]   ;;  %v532_v4 = vld [vmem:[#allocation5 + $0x78] sm:$0xff]   ;;  %v527_v5 = vld [vmem:[#allocation5 + $0x20] sm:$0xff]   ;;  %s620_s28 = smov [#allocation7]  }
  0x1c   :  { %477 = vmatprep.subr.bf16.mxu1 %v618_v0  ;;  %493 = vmatprep.mubr.msk.bf16.mxu1 %vm619_vm0, %v618_v0  ;;  %v533_v6 = vld [vmem:[#allocation5 + $0x70] sm:$0xff]   ;;  %v528_v7 = vld [vmem:[#allocation5 + $0x18] sm:$0xff]   ;;  %v534_v8 = vld [vmem:[#allocation5 + $0x68] sm:$0xff]   ;;  %s391_s29 = sshll.u32 %s620_s28, 4  ;;  %s392_s29 = int_to_ptr.vmem [resolvable:$true] %s391_s29 }
  0x1d   :  { %458 = vmatpush3.bf16.msra.mxu0 %v524_v1  ;;  %478 = vmatpush3.bf16.msra.mxu1 %v532_v4  ;;  %v529_v9 = vld [vmem:[#allocation5 + $0x10] sm:$0xff]   ;;  %v535_v10 = vld [vmem:[#allocation5 + $0x60] sm:$0xff]   ;;  %v530_v11 = vld [vmem:[#allocation5 + $0x8] sm:$0xff]   ;;  %s588_s30 = scalar_lea.vmem %s392_s29, 128  ;;  %p593_p11 = scmp.lt.s32.totalorder %s392_s29, %s392_s29 }
  0x1e   :  { %459 = vmatprep.subr.bf16.mxu0 %v618_v0  ;;  %479 = vmatprep.subr.bf16.mxu1 %v618_v0  ;;  %v536_v12 = vld [vmem:[#allocation5 + $0x58] sm:$0xff]   ;;  %v531_v13 = vld [vmem:[#allocation5] sm:$0xff]   ;;  %v537_v14 = vld [vmem:[#allocation5 + $0x50] sm:$0xff]   ;;  %p589_p10 = scmp.ne.s32.totalorder %s392_s29, %s588_s30  ;;  %p594_p12 = scmp.lt.s32.totalorder %s588_s30, %s588_s30 }
  0x1f   :  { %v42_v15 = vld [vmem:[#allocation2] sm:$0xf]  ;;  %v538_v16 = vld [vmem:[#allocation5 + $0x48] sm:$0xff]   ;;  %v539_v17 = vld [vmem:[#allocation5 + $0x40] sm:$0xff]  }
  0x20   :  { %v540_v18 = vld [vmem:[#allocation5 + $0xb8] sm:$0xff]   ;;  %v541_v19 = vld [vmem:[#allocation5 + $0xb0] sm:$0xff]   ;;  %v542_v20 = vld [vmem:[#allocation5 + $0xa8] sm:$0xff]   ;;  %p595_p13 = por %p594_p12, %p593_p11 }
  0x21   :  { %460 = vmatpush3.bf16.msra.mxu0 %v525_v2  ;;  %480 = vmatpush3.bf16.msra.mxu1 %v533_v6  ;;  %v543_v21 = vld [vmem:[#allocation5 + $0xa0] sm:$0xff]   ;;  %v544_v22 = vld [vmem:[#allocation5 + $0x98] sm:$0xff]   ;;  %v545_v23 = vld [vmem:[#allocation5 + $0x90] sm:$0xff]  }
  0x22   :  { %461 = vmatprep.subr.bf16.mxu0 %v618_v0  ;;  %481 = vmatprep.subr.bf16.mxu1 %v618_v0  ;;  %v401_v24 = vld [vmem:[%s691_s2] ss:$0 sm:$0xff]  ;;  %v546_v32 = vld [vmem:[#allocation5 + $0x88] sm:$0xff]   ;;  %v547_v33 = vld [vmem:[#allocation5 + $0x80] sm:$0xff]   ;;  %p596_p0 = pnand %p595_p13, %p589_p10 }
  0x23   :  { %v411_v34 = vld [vmem:[%s691_s2 + $0x1] ss:$0 sm:$0xff]  ;;  %v421_v42 = vld [vmem:[%s691_s2 + $0x2] ss:$0 sm:$0xff] }
  0x25   :  { %462 = vmatpush3.bf16.msra.mxu0 %v526_v3  ;;  %482 = vmatpush3.bf16.msra.mxu1 %v534_v8 }
  0x26   :  { %463 = vmatprep.subr.bf16.mxu0 %v618_v0  ;;  %483 = vmatprep.subr.bf16.mxu1 %v618_v0 }
  0x29   :  { %464 = vmatpush3.bf16.msra.mxu0 %v527_v5  ;;  %484 = vmatpush3.bf16.msra.mxu1 %v535_v10 }
  0x2a   :  { %465 = vmatprep.subr.bf16.mxu0 %v618_v0  ;;  %485 = vmatprep.subr.bf16.mxu1 %v618_v0 }
  0x2d   :  { %466 = vmatpush3.bf16.msra.mxu0 %v528_v7  ;;  %486 = vmatpush3.bf16.msra.mxu1 %v536_v12 }
  0x2e   :  { %467 = vmatprep.subr.bf16.mxu0 %v618_v0  ;;  %487 = vmatprep.subr.bf16.mxu1 %v618_v0 }
  0x31   :  { %468 = vmatpush3.bf16.msra.mxu0 %v529_v9  ;;  %488 = vmatpush3.bf16.msra.mxu1 %v537_v14 }
  0x32   :  { %469 = vmatprep.subr.bf16.mxu0 %v618_v0  ;;  %489 = vmatprep.subr.bf16.mxu1 %v618_v0 }
  0x35   :  { %470 = vmatpush3.bf16.msra.mxu0 %v530_v11  ;;  %490 = vmatpush3.bf16.msra.mxu1 %v538_v16 }
  0x36   :  { %471 = vmatprep.subr.bf16.mxu0 %v618_v0  ;;  %491 = vmatprep.subr.bf16.mxu1 %v618_v0 }
  0x39   :  { %472 = vmatpush3.bf16.msra.mxu0 %v531_v13  ;;  %492 = vmatpush3.bf16.msra.mxu1 %v539_v17 }
  0x3a   :  { %497 = vmatprep.subr.bf16.mxu0 %v618_v0 }
  0x3c   :  { %474 = vmatmul.mubr.bf16.vlgmr.msra.gmra.mxu0 %v42_v15 }
  0x3d   :  { %513 = vmatprep.mubr.msk.bf16.mxu0 %vm619_vm0, %v618_v0  ;;  %498 = vmatpush3.bf16.msra.mxu0 %v540_v18 }
  0x3e   :  { %499 = vmatprep.subr.bf16.mxu0 %v618_v0 }
  0x41   :  { %500 = vmatpush3.bf16.msra.mxu0 %v541_v19 }
  0x42   :  { %501 = vmatprep.subr.bf16.mxu0 %v618_v0 }
  0x45   :  { %502 = vmatpush3.bf16.msra.mxu0 %v542_v20 }
  0x46   :  { %503 = vmatprep.subr.bf16.mxu0 %v618_v0 }
  0x49   :  { %504 = vmatpush3.bf16.msra.mxu0 %v543_v21 }
  0x4a   :  { %505 = vmatprep.subr.bf16.mxu0 %v618_v0 }
  0x4d   :  { %506 = vmatpush3.bf16.msra.mxu0 %v544_v22 }
  0x4e   :  { %507 = vmatprep.subr.bf16.mxu0 %v618_v0 }
  0x51   :  { %508 = vmatpush3.bf16.msra.mxu0 %v545_v23 }
  0x52   :  { %509 = vmatprep.subr.bf16.mxu0 %v618_v0 }
  0x55   :  { %510 = vmatpush3.bf16.msra.mxu0 %v546_v32 }
  0x56   :  { %511 = vmatprep.subr.bf16.mxu0 %v618_v0 }
  0x59   :  { %512 = vmatpush3.bf16.msra.mxu0 %v547_v33 }
  0xfc   :  { %v148_v25 = vpop.f32.mrf.mxu0 }
  0xfd   :  { %v149_v26 = vadd.f32 %v401_v24, %v148_v25 }
  0xfe   :  { %v475_v27 = vpop.f32.mrf.mxu0 }
  0xff   :  { %v154_v28 = vmax.f32 %v149_v26, 0.0 }
 0x100   :  { %v151_v29 = vpop.f32.mrf.mxu0 }
 0x101   :  { %v155_v30 = vpack.c.bf16 %v154_v28, %v154_v28 }
 0x102   :  { %v476_v31 = vpop.f32.mrf.mxu0 }
 0x103   :  { %494 = vmatmul.mubr.bf16.vlgmr.msra.gmra.mxu1 %v155_v30 }
 0x1c3   :  { %v263_v35 = vpop.f32.mrf.mxu1 }
 0x1c4   :  { %v264_v36 = vadd.f32 %v411_v34, %v263_v35 }
 0x1c5   :  { %v495_v37 = vpop.f32.mrf.mxu1 }
 0x1c6   :  { %v269_v38 = vmax.f32 %v264_v36, 0.0 }
 0x1c7   :  { %v266_v39 = vpop.f32.mrf.mxu1 }
 0x1c8   :  { %v270_v40 = vpack.c.bf16 %v269_v38, %v269_v38 }
 0x1c9   :  { %v496_v41 = vpop.f32.mrf.mxu1 }
 0x1ca   :  { %514 = vmatmul.mubr.bf16.vlgmr.msra.gmra.mxu0 %v270_v40 }
 0x28a   :  { %v378_v43 = vpop.f32.mrf.mxu0 }
 0x28b   :  { %v379_v44 = vadd.f32 %v421_v42, %v378_v43 }
 0x28c   :  { %v515_v45 = vpop.f32.mrf.mxu0 }
 0x28d   :  { %384 = vst [vmem:[#allocation7] sm:$0xff] %v379_v44 }
 0x28e   :  { %v381_v46 = vpop.f32.mrf.mxu0 }
 0x28f   :  { %599 = shalt.err (!%p596_p0)
}
 0x290   :  { %394 = dma.vmem_to_hbm [thread:$0]  %s392_s29, 128, %s692_s3, [#allocation4]   ;;  %v516_v47 = vpop.f32.mrf.mxu0 }
 0x291   :  { %612 = dma.done.wait [#allocation4], 128  }
 0x292   :  { %613 = vsyncadd [#allocation4], 4294967168 }
 0x293   :  { %398 = vsyncpa [#allocation3], 1 }
 0x294   :  { %399 = vsyncpa [#allocation6], 1 }
 0x295   :  { %400 = vsyncpa [#allocation4], 1 }

</bundles_post_ra>
